<compile_context>
chip_gen: v6e
topology: v6e:2x2x1
jax: 0.10.0
libtpu: 0.0.40
codegen_flags: <defaults>
</compile_context>

<pallas_src>
import functools

import jax
import jax.numpy as jnp
from jax import lax
from jax.experimental import pallas as pl
from jax.experimental.pallas import tpu as pltpu


_LANE = 128
_K = 3          # ConvNormRelu defaults: kernel_size=3, stride=1, padding=1
_PACK = 16      # bf16 sublane-pack granule


def _round_up(v, m):
    return ((v + m - 1) // m) * m


def _layer_channels(C_in, C_out, min_layer_nums=None):
    """Mirror AudioPoseEncoder1D's channel progression."""
    mln = 0 if min_layer_nums is None else min_layer_nums
    chans = []
    cur = C_in
    n = 0
    while cur < C_out:
        chans.append((cur, cur * 2))
        cur *= 2
        n += 1
    if cur != C_out or n < mln:
        while cur != C_out or n < mln:
            chans.append((cur, C_out))
            cur = C_out
            n += 1
    return chans


def _make_kernel(num_layers, tile_T, T_total, C_out):
    L = num_layers

    def kernel(x_ref, *args):
        # x_ref        : (tile_T + 2L, Ci0)   bf16, out-of-sequence rows are 0
        # args[2l]     : (3, ci_l, co_pad_l)  bf16 weights, BN scale folded in
        # args[2l + 1] : (1, co_pad_l)        f32 folded per-channel shift
        # args[-1]     : (tile_T, C_out)      f32 output tile
        out_ref = args[-1]
        j = pl.program_id(1)
        cur = x_ref[...]                              # (W0, Ci0) bf16
        for l in range(L):                            # static unroll (small L)
            w_ref = args[2 * l]
            s_ref = args[2 * l + 1]
            w_out = tile_T + 2 * (L - l) - 2          # window shrinks by 2/layer
            # k=3 'same' conv == 3 shifted MXU matmuls; acc starts from tap 0.
            acc = jnp.dot(cur[0:w_out, :], w_ref[0],
                          preferred_element_type=jnp.float32)
            acc = acc + jnp.dot(cur[1:w_out + 1, :], w_ref[1],
                                preferred_element_type=jnp.float32)
            acc = acc + jnp.dot(cur[2:w_out + 2, :], w_ref[2],
                                preferred_element_type=jnp.float32)
            y = jnp.maximum(acc + s_ref[...], 0.0)    # bias+BN shift, ReLU (f32)
            if l < L - 1:
                # Per-layer 'same' zero padding at the true sequence ends: rows
                # whose global time index falls outside [0, T) must enter the
                # next layer as exact zeros (ReLU(shift) != 0 in general).
                g0 = j * tile_T - (L - l - 1)
                rows = lax.broadcasted_iota(jnp.int32, y.shape, 0) + g0
                y = jnp.where((rows >= 0) & (rows < T_total), y, 0.0)
                cur = y.astype(jnp.bfloat16)          # bf16 MXU operand
            else:
                out_ref[...] = y[:, :C_out]           # drop lane padding

    return kernel


def audio_pose_encoder_1d_pallas(x, params, *, eps=1e-5, tile_t=512):
    """x: (B, C_in, T) -> (B, C_out, T) (eval-mode BN, dropout p=0)."""
    B, C_in, T = x.shape
    layers = params["layers"]
    L = len(layers)
    if L == 0:                       # C_in == C_out with min_layer_nums=None
        return x
    C_out = layers[-1][0].shape[0]

    # --- T tiling with an L-row recompute halo per side --------------------
    if tile_t >= T:
        tile_T = T
    else:
        tile_T = max(8, (tile_t // 8) * 8)
    num_t = pl.cdiv(T, tile_T)
    T_pad = num_t * tile_T
    W0 = tile_T + 2 * L

    # --- fold BN into weights / shift, per-layer lane padding --------------
    ci0 = _round_up(C_in, _PACK)     # input channels: bf16 pack granule only
    w_list, s_list = [], []
    ci_eff = ci0
    for (W, b, gamma, beta, mean, var) in layers:
        co_l, ci_l, _ = W.shape
        co_pad = max(_LANE, _round_up(co_l, _LANE))
        scale = gamma / jnp.sqrt(var + eps)                        # (co_l,)
        shift = (b - mean) * scale + beta                          # (co_l,)
        wt = jnp.transpose(W, (2, 1, 0)) * scale[None, None, :]    # (3, ci_l, co_l)
        w = jnp.zeros((_K, ci_eff, co_pad), jnp.float32)
        w = w.at[:, :ci_l, :co_l].set(wt)
        w_list.append(w.astype(jnp.bfloat16))
        s_list.append(jnp.zeros((1, co_pad), jnp.float32).at[0, :co_l].set(shift))
        ci_eff = co_pad              # next layer consumes the padded width

    # --- materialize overlapped (haloed) bf16 input tiles ------------------
    x_btc = jnp.transpose(x, (0, 2, 1)).astype(jnp.float32)        # (B, T, C_in)
    x_halo = jnp.pad(x_btc, ((0, 0), (L, T_pad - T + L), (0, ci0 - C_in)))
    x_halo = x_halo.astype(jnp.bfloat16)                           # (B, T_pad+2L, ci0)
    rows = jnp.arange(num_t)[:, None] * tile_T + jnp.arange(W0)[None, :]
    x_tiles = x_halo[:, rows, :]                                   # (B, num_t, W0, ci0)

    in_specs = [pl.BlockSpec((None, None, W0, ci0), lambda b, j: (b, j, 0, 0))]
    operands = [x_tiles]
    for w, s in zip(w_list, s_list):
        in_specs.append(pl.BlockSpec(w.shape, lambda b, j: (0, 0, 0)))
        in_specs.append(pl.BlockSpec(s.shape, lambda b, j: (0, 0)))
        operands.extend([w, s])

    out = pl.pallas_call(
        _make_kernel(L, tile_T, T, C_out),
        out_shape=jax.ShapeDtypeStruct((B, T_pad, C_out), jnp.float32),
        grid=(B, num_t),
        in_specs=in_specs,
        out_specs=pl.BlockSpec((None, tile_T, C_out), lambda b, j: (b, j, 0)),
        compiler_params=pltpu.CompilerParams(
            dimension_semantics=("parallel", "parallel"),
            vmem_limit_bytes=48 * 1024 * 1024),  # below v7x's 64 MiB physical
    )(*operands)

    return jnp.transpose(out[:, :T, :], (0, 2, 1))                 # (B, C_out, T)


def audio_pose_encoder_1d_ref(x, params, *, eps=1e-5):
    """Pure-JAX f32 reference: Conv1d -> eval-mode BatchNorm1d -> ReLU per layer."""
    out = x
    for (W, b, gamma, beta, mean, var) in params["layers"]:
        y = lax.conv_general_dilated(
            out, W, window_strides=(1,), padding=((1, 1),),
            dimension_numbers=("NCH", "OIH", "NCH"))
        y = y + b[None, :, None]
        y = (y - mean[None, :, None]) * (gamma / jnp.sqrt(var + eps))[None, :, None] \
            + beta[None, :, None]
        out = jnp.maximum(y, 0.0)
    return out


def init_params(key, C_in, C_out, min_layer_nums=None):
    """Deterministic init matching the Conv1d / BatchNorm1d parameter shapes."""
    layers = []
    for (ci, co) in _layer_channels(C_in, C_out, min_layer_nums):
        key, kw, kb, kg, kbe, km, kv = jax.random.split(key, 7)
        scale = 1.0 / jnp.sqrt(jnp.float32(ci * _K))
        W = jax.random.uniform(kw, (co, ci, _K), jnp.float32, -scale, scale)
        b = jax.random.uniform(kb, (co,), jnp.float32, -scale, scale)
        gamma = jax.random.uniform(kg, (co,), jnp.float32, 0.5, 1.5)
        beta = jax.random.uniform(kbe, (co,), jnp.float32, -0.5, 0.5)
        mean = jax.random.uniform(km, (co,), jnp.float32, -0.5, 0.5)
        var = jax.random.uniform(kv, (co,), jnp.float32, 0.5, 1.5)
        layers.append((W, b, gamma, beta, mean, var))
    return {"layers": layers}


if __name__ == "__main__":
    B, C_in, C_out, T = 2, 4, 32, 16   # layers: 4 -> 8 -> 16 -> 32

    key = jax.random.PRNGKey(0)
    key, kx, kp = jax.random.split(key, 3)
    x = jax.random.normal(kx, (B, C_in, T), jnp.float32)
    params = init_params(kp, C_in, C_out)

    # tile_t=8 exercises the multi-tile (recompute-halo + boundary-mask) path
    # even at this small size; production sizes would use the default 512.
    fn = jax.jit(functools.partial(audio_pose_encoder_1d_pallas, tile_t=8))
    out = jax.block_until_ready(fn(x, params))

    ref = audio_pose_encoder_1d_ref(x, params)
    assert out.shape == (B, C_out, T), out.shape
    # bf16 MXU operands with f32 accumulation -> loosened tolerance vs f32 ref.
    assert jnp.allclose(out, ref, atol=5e-2, rtol=5e-2), (
        float(jnp.max(jnp.abs(out - ref))))

    print("KERNEL_OK")
</pallas_src>

<mosaic_0001>
module attributes {stable_mosaic.version = 11 : i64} {
  func.func @kernel(%arg0: i32, %arg1: i32, %arg2: memref<1x1x14x16xbf16, #tpu.memory_space<vmem>>, %arg3: memref<3x16x128xbf16, #tpu.memory_space<vmem>>, %arg4: memref<1x128xf32, #tpu.memory_space<vmem>>, %arg5: memref<3x128x128xbf16, #tpu.memory_space<vmem>>, %arg6: memref<1x128xf32, #tpu.memory_space<vmem>>, %arg7: memref<3x128x128xbf16, #tpu.memory_space<vmem>>, %arg8: memref<1x128xf32, #tpu.memory_space<vmem>>, %arg9: memref<1x8x32xf32, #tpu.memory_space<vmem>>) attributes {dimension_semantics = [#tpu.dimension_semantics<parallel>, #tpu.dimension_semantics<parallel>], iteration_bounds = array<i64: 2, 2>, scalar_prefetch = 0 : i64, scratch_operands = 0 : i64, tpu.core_type = #tpu.core_type<tc>, window_params = [{transform_indices = @transform_0, window_bounds = array<i64: 1, 1, 14, 16>}, {pipeline_mode = #tpu.pipeline_mode<synchronous>, transform_indices = @transform_1, window_bounds = array<i64: 3, 16, 128>}, {pipeline_mode = #tpu.pipeline_mode<synchronous>, transform_indices = @transform_2, window_bounds = array<i64: 1, 128>}, {pipeline_mode = #tpu.pipeline_mode<synchronous>, transform_indices = @transform_3, window_bounds = array<i64: 3, 128, 128>}, {pipeline_mode = #tpu.pipeline_mode<synchronous>, transform_indices = @transform_4, window_bounds = array<i64: 1, 128>}, {pipeline_mode = #tpu.pipeline_mode<synchronous>, transform_indices = @transform_5, window_bounds = array<i64: 3, 128, 128>}, {pipeline_mode = #tpu.pipeline_mode<synchronous>, transform_indices = @transform_6, window_bounds = array<i64: 1, 128>}, {transform_indices = @transform_7, window_bounds = array<i64: 1, 8, 32>}]} {
    %c0 = arith.constant 0 : index
    %c0_0 = arith.constant 0 : index
    %c0_1 = arith.constant 0 : index
    %c0_2 = arith.constant 0 : index
    %0 = vector.load %arg2[%c0, %c0_0, %c0_1, %c0_2] : memref<1x1x14x16xbf16, #tpu.memory_space<vmem>>, vector<1x1x14x16xbf16>
    %1 = vector.shape_cast %0 : vector<1x1x14x16xbf16> to vector<14x16xbf16>
    %2 = vector.extract_strided_slice %1 {offsets = [0, 0], sizes = [12, 16], strides = [1, 1]} : vector<14x16xbf16> to vector<12x16xbf16>
    %c0_3 = arith.constant 0 : index
    %c0_4 = arith.constant 0 : index
    %c0_5 = arith.constant 0 : index
    %3 = vector.load %arg3[%c0_3, %c0_4, %c0_5] : memref<3x16x128xbf16, #tpu.memory_space<vmem>>, vector<1x16x128xbf16>
    %4 = vector.shape_cast %3 : vector<1x16x128xbf16> to vector<16x128xbf16>
    %cst = arith.constant dense<0.000000e+00> : vector<12x128xf32>
    %5 = tpu.matmul %2, %4, %cst {dimension_numbers = #tpu.dot_dimension_numbers<[1], [0], [0], [1], [0, 0, 1, 1], [], []>} : vector<12x16xbf16>, vector<16x128xbf16>, vector<12x128xf32> -> vector<12x128xf32>
    %6 = vector.extract_strided_slice %1 {offsets = [1, 0], sizes = [12, 16], strides = [1, 1]} : vector<14x16xbf16> to vector<12x16xbf16>
    %c1 = arith.constant 1 : index
    %c0_6 = arith.constant 0 : index
    %c0_7 = arith.constant 0 : index
    %7 = vector.load %arg3[%c1, %c0_6, %c0_7] : memref<3x16x128xbf16, #tpu.memory_space<vmem>>, vector<1x16x128xbf16>
    %8 = vector.shape_cast %7 : vector<1x16x128xbf16> to vector<16x128xbf16>
    %cst_8 = arith.constant dense<0.000000e+00> : vector<12x128xf32>
    %9 = tpu.matmul %6, %8, %cst_8 {dimension_numbers = #tpu.dot_dimension_numbers<[1], [0], [0], [1], [0, 0, 1, 1], [], []>} : vector<12x16xbf16>, vector<16x128xbf16>, vector<12x128xf32> -> vector<12x128xf32>
    %10 = arith.addf %5, %9 : vector<12x128xf32>
    %11 = vector.extract_strided_slice %1 {offsets = [2, 0], sizes = [12, 16], strides = [1, 1]} : vector<14x16xbf16> to vector<12x16xbf16>
    %c2 = arith.constant 2 : index
    %c0_9 = arith.constant 0 : index
    %c0_10 = arith.constant 0 : index
    %12 = vector.load %arg3[%c2, %c0_9, %c0_10] : memref<3x16x128xbf16, #tpu.memory_space<vmem>>, vector<1x16x128xbf16>
    %13 = vector.shape_cast %12 : vector<1x16x128xbf16> to vector<16x128xbf16>
    %cst_11 = arith.constant dense<0.000000e+00> : vector<12x128xf32>
    %14 = tpu.matmul %11, %13, %cst_11 {dimension_numbers = #tpu.dot_dimension_numbers<[1], [0], [0], [1], [0, 0, 1, 1], [], []>} : vector<12x16xbf16>, vector<16x128xbf16>, vector<12x128xf32> -> vector<12x128xf32>
    %15 = arith.addf %10, %14 : vector<12x128xf32>
    %c0_12 = arith.constant 0 : index
    %c0_13 = arith.constant 0 : index
    %16 = vector.load %arg4[%c0_12, %c0_13] : memref<1x128xf32, #tpu.memory_space<vmem>>, vector<1x128xf32>
    %17 = vector.broadcast %16 : vector<1x128xf32> to vector<12x128xf32>
    %18 = arith.addf %15, %17 : vector<12x128xf32>
    %cst_14 = arith.constant 0.000000e+00 : f32
    %19 = vector.broadcast %cst_14 : f32 to vector<12x128xf32>
    %20 = arith.maximumf %18, %19 : vector<12x128xf32>
    %c8_i32 = arith.constant 8 : i32
    %21 = arith.muli %arg1, %c8_i32 : i32
    %c2_i32 = arith.constant 2 : i32
    %22 = arith.subi %21, %c2_i32 : i32
    %23 = tpu.iota {dimensions = array<i32: 0>} : vector<12x128xi32>
    %24 = vector.broadcast %22 : i32 to vector<12x128xi32>
    %25 = arith.addi %23, %24 : vector<12x128xi32>
    %c0_i32 = arith.constant 0 : i32
    %26 = vector.broadcast %c0_i32 : i32 to vector<12x128xi32>
    %27 = arith.cmpi sge, %25, %26 : vector<12x128xi32>
    %c16_i32 = arith.constant 16 : i32
    %28 = vector.broadcast %c16_i32 : i32 to vector<12x128xi32>
    %29 = arith.cmpi slt, %25, %28 : vector<12x128xi32>
    %30 = arith.andi %27, %29 : vector<12x128xi1>
    %cst_15 = arith.constant 0.000000e+00 : f32
    %31 = vector.broadcast %cst_15 : f32 to vector<12x128xf32>
    %32 = arith.select %30, %20, %31 : vector<12x128xi1>, vector<12x128xf32>
    %33 = arith.truncf %32 : vector<12x128xf32> to vector<12x128xbf16>
    %34 = vector.extract_strided_slice %33 {offsets = [0, 0], sizes = [10, 128], strides = [1, 1]} : vector<12x128xbf16> to vector<10x128xbf16>
    %c0_16 = arith.constant 0 : index
    %c0_17 = arith.constant 0 : index
    %c0_18 = arith.constant 0 : index
    %35 = vector.load %arg5[%c0_16, %c0_17, %c0_18] : memref<3x128x128xbf16, #tpu.memory_space<vmem>>, vector<1x128x128xbf16>
    %36 = vector.shape_cast %35 : vector<1x128x128xbf16> to vector<128x128xbf16>
    %cst_19 = arith.constant dense<0.000000e+00> : vector<10x128xf32>
    %37 = tpu.matmul %34, %36, %cst_19 {dimension_numbers = #tpu.dot_dimension_numbers<[1], [0], [0], [1], [0, 0, 1, 1], [], []>} : vector<10x128xbf16>, vector<128x128xbf16>, vector<10x128xf32> -> vector<10x128xf32>
    %38 = vector.extract_strided_slice %33 {offsets = [1, 0], sizes = [10, 128], strides = [1, 1]} : vector<12x128xbf16> to vector<10x128xbf16>
    %c1_20 = arith.constant 1 : index
    %c0_21 = arith.constant 0 : index
    %c0_22 = arith.constant 0 : index
    %39 = vector.load %arg5[%c1_20, %c0_21, %c0_22] : memref<3x128x128xbf16, #tpu.memory_space<vmem>>, vector<1x128x128xbf16>
    %40 = vector.shape_cast %39 : vector<1x128x128xbf16> to vector<128x128xbf16>
    %cst_23 = arith.constant dense<0.000000e+00> : vector<10x128xf32>
    %41 = tpu.matmul %38, %40, %cst_23 {dimension_numbers = #tpu.dot_dimension_numbers<[1], [0], [0], [1], [0, 0, 1, 1], [], []>} : vector<10x128xbf16>, vector<128x128xbf16>, vector<10x128xf32> -> vector<10x128xf32>
    %42 = arith.addf %37, %41 : vector<10x128xf32>
    %43 = vector.extract_strided_slice %33 {offsets = [2, 0], sizes = [10, 128], strides = [1, 1]} : vector<12x128xbf16> to vector<10x128xbf16>
    %c2_24 = arith.constant 2 : index
    %c0_25 = arith.constant 0 : index
    %c0_26 = arith.constant 0 : index
    %44 = vector.load %arg5[%c2_24, %c0_25, %c0_26] : memref<3x128x128xbf16, #tpu.memory_space<vmem>>, vector<1x128x128xbf16>
    %45 = vector.shape_cast %44 : vector<1x128x128xbf16> to vector<128x128xbf16>
    %cst_27 = arith.constant dense<0.000000e+00> : vector<10x128xf32>
    %46 = tpu.matmul %43, %45, %cst_27 {dimension_numbers = #tpu.dot_dimension_numbers<[1], [0], [0], [1], [0, 0, 1, 1], [], []>} : vector<10x128xbf16>, vector<128x128xbf16>, vector<10x128xf32> -> vector<10x128xf32>
    %47 = arith.addf %42, %46 : vector<10x128xf32>
    %c0_28 = arith.constant 0 : index
    %c0_29 = arith.constant 0 : index
    %48 = vector.load %arg6[%c0_28, %c0_29] : memref<1x128xf32, #tpu.memory_space<vmem>>, vector<1x128xf32>
    %49 = vector.broadcast %48 : vector<1x128xf32> to vector<10x128xf32>
    %50 = arith.addf %47, %49 : vector<10x128xf32>
    %cst_30 = arith.constant 0.000000e+00 : f32
    %51 = vector.broadcast %cst_30 : f32 to vector<10x128xf32>
    %52 = arith.maximumf %50, %51 : vector<10x128xf32>
    %c8_i32_31 = arith.constant 8 : i32
    %53 = arith.muli %arg1, %c8_i32_31 : i32
    %c1_i32 = arith.constant 1 : i32
    %54 = arith.subi %53, %c1_i32 : i32
    %55 = tpu.iota {dimensions = array<i32: 0>} : vector<10x128xi32>
    %56 = vector.broadcast %54 : i32 to vector<10x128xi32>
    %57 = arith.addi %55, %56 : vector<10x128xi32>
    %c0_i32_32 = arith.constant 0 : i32
    %58 = vector.broadcast %c0_i32_32 : i32 to vector<10x128xi32>
    %59 = arith.cmpi sge, %57, %58 : vector<10x128xi32>
    %c16_i32_33 = arith.constant 16 : i32
    %60 = vector.broadcast %c16_i32_33 : i32 to vector<10x128xi32>
    %61 = arith.cmpi slt, %57, %60 : vector<10x128xi32>
    %62 = arith.andi %59, %61 : vector<10x128xi1>
    %cst_34 = arith.constant 0.000000e+00 : f32
    %63 = vector.broadcast %cst_34 : f32 to vector<10x128xf32>
    %64 = arith.select %62, %52, %63 : vector<10x128xi1>, vector<10x128xf32>
    %65 = arith.truncf %64 : vector<10x128xf32> to vector<10x128xbf16>
    %66 = vector.extract_strided_slice %65 {offsets = [0, 0], sizes = [8, 128], strides = [1, 1]} : vector<10x128xbf16> to vector<8x128xbf16>
    %c0_35 = arith.constant 0 : index
    %c0_36 = arith.constant 0 : index
    %c0_37 = arith.constant 0 : index
    %67 = vector.load %arg7[%c0_35, %c0_36, %c0_37] : memref<3x128x128xbf16, #tpu.memory_space<vmem>>, vector<1x128x128xbf16>
    %68 = vector.shape_cast %67 : vector<1x128x128xbf16> to vector<128x128xbf16>
    %cst_38 = arith.constant dense<0.000000e+00> : vector<8x128xf32>
    %69 = tpu.matmul %66, %68, %cst_38 {dimension_numbers = #tpu.dot_dimension_numbers<[1], [0], [0], [1], [0, 0, 1, 1], [], []>} : vector<8x128xbf16>, vector<128x128xbf16>, vector<8x128xf32> -> vector<8x128xf32>
    %70 = vector.extract_strided_slice %65 {offsets = [1, 0], sizes = [8, 128], strides = [1, 1]} : vector<10x128xbf16> to vector<8x128xbf16>
    %c1_39 = arith.constant 1 : index
    %c0_40 = arith.constant 0 : index
    %c0_41 = arith.constant 0 : index
    %71 = vector.load %arg7[%c1_39, %c0_40, %c0_41] : memref<3x128x128xbf16, #tpu.memory_space<vmem>>, vector<1x128x128xbf16>
    %72 = vector.shape_cast %71 : vector<1x128x128xbf16> to vector<128x128xbf16>
    %cst_42 = arith.constant dense<0.000000e+00> : vector<8x128xf32>
    %73 = tpu.matmul %70, %72, %cst_42 {dimension_numbers = #tpu.dot_dimension_numbers<[1], [0], [0], [1], [0, 0, 1, 1], [], []>} : vector<8x128xbf16>, vector<128x128xbf16>, vector<8x128xf32> -> vector<8x128xf32>
    %74 = arith.addf %69, %73 : vector<8x128xf32>
    %75 = vector.extract_strided_slice %65 {offsets = [2, 0], sizes = [8, 128], strides = [1, 1]} : vector<10x128xbf16> to vector<8x128xbf16>
    %c2_43 = arith.constant 2 : index
    %c0_44 = arith.constant 0 : index
    %c0_45 = arith.constant 0 : index
    %76 = vector.load %arg7[%c2_43, %c0_44, %c0_45] : memref<3x128x128xbf16, #tpu.memory_space<vmem>>, vector<1x128x128xbf16>
    %77 = vector.shape_cast %76 : vector<1x128x128xbf16> to vector<128x128xbf16>
    %cst_46 = arith.constant dense<0.000000e+00> : vector<8x128xf32>
    %78 = tpu.matmul %75, %77, %cst_46 {dimension_numbers = #tpu.dot_dimension_numbers<[1], [0], [0], [1], [0, 0, 1, 1], [], []>} : vector<8x128xbf16>, vector<128x128xbf16>, vector<8x128xf32> -> vector<8x128xf32>
    %79 = arith.addf %74, %78 : vector<8x128xf32>
    %c0_47 = arith.constant 0 : index
    %c0_48 = arith.constant 0 : index
    %80 = vector.load %arg8[%c0_47, %c0_48] : memref<1x128xf32, #tpu.memory_space<vmem>>, vector<1x128xf32>
    %81 = vector.broadcast %80 : vector<1x128xf32> to vector<8x128xf32>
    %82 = arith.addf %79, %81 : vector<8x128xf32>
    %cst_49 = arith.constant 0.000000e+00 : f32
    %83 = vector.broadcast %cst_49 : f32 to vector<8x128xf32>
    %84 = arith.maximumf %82, %83 : vector<8x128xf32>
    %85 = vector.extract_strided_slice %84 {offsets = [0, 0], sizes = [8, 32], strides = [1, 1]} : vector<8x128xf32> to vector<8x32xf32>
    %c0_50 = arith.constant 0 : index
    %c0_51 = arith.constant 0 : index
    %c0_52 = arith.constant 0 : index
    %86 = vector.load %arg9[%c0_50, %c0_51, %c0_52] : memref<1x8x32xf32, #tpu.memory_space<vmem>>, vector<1x8x32xf32>
    %87 = vector.shape_cast %86 : vector<1x8x32xf32> to vector<8x32xf32>
    %88 = vector.shape_cast %85 : vector<8x32xf32> to vector<1x8x32xf32>
    tpu.vector_store %arg9[%c0_50, %c0_51, %c0_52], %88 {strides = array<i32>} : memref<1x8x32xf32, #tpu.memory_space<vmem>>, vector<1x8x32xf32>,
    return
  }
  func.func @transform_0(%arg0: i32, %arg1: i32) -> (i32, i32, i32, i32) {
    %c0_i32 = arith.constant 0 : i32
    %c0_i32_0 = arith.constant 0 : i32
    %c0_i32_1 = arith.constant 0 : i32
    return %arg0, %arg1, %c0_i32, %c0_i32_0 : i32, i32, i32, i32
  }
  func.func @transform_1(%arg0: i32, %arg1: i32) -> (i32, i32, i32) {
    %c0_i32 = arith.constant 0 : i32
    %c0_i32_0 = arith.constant 0 : i32
    %c0_i32_1 = arith.constant 0 : i32
    %c0_i32_2 = arith.constant 0 : i32
    return %c0_i32, %c0_i32_0, %c0_i32_1 : i32, i32, i32
  }
  func.func @transform_2(%arg0: i32, %arg1: i32) -> (i32, i32) {
    %c0_i32 = arith.constant 0 : i32
    %c0_i32_0 = arith.constant 0 : i32
    %c0_i32_1 = arith.constant 0 : i32
    return %c0_i32, %c0_i32_0 : i32, i32
  }
  func.func @transform_3(%arg0: i32, %arg1: i32) -> (i32, i32, i32) {
    %c0_i32 = arith.constant 0 : i32
    %c0_i32_0 = arith.constant 0 : i32
    %c0_i32_1 = arith.constant 0 : i32
    %c0_i32_2 = arith.constant 0 : i32
    return %c0_i32, %c0_i32_0, %c0_i32_1 : i32, i32, i32
  }
  func.func @transform_4(%arg0: i32, %arg1: i32) -> (i32, i32) {
    %c0_i32 = arith.constant 0 : i32
    %c0_i32_0 = arith.constant 0 : i32
    %c0_i32_1 = arith.constant 0 : i32
    return %c0_i32, %c0_i32_0 : i32, i32
  }
  func.func @transform_5(%arg0: i32, %arg1: i32) -> (i32, i32, i32) {
    %c0_i32 = arith.constant 0 : i32
    %c0_i32_0 = arith.constant 0 : i32
    %c0_i32_1 = arith.constant 0 : i32
    %c0_i32_2 = arith.constant 0 : i32
    return %c0_i32, %c0_i32_0, %c0_i32_1 : i32, i32, i32
  }
  func.func @transform_6(%arg0: i32, %arg1: i32) -> (i32, i32) {
    %c0_i32 = arith.constant 0 : i32
    %c0_i32_0 = arith.constant 0 : i32
    %c0_i32_1 = arith.constant 0 : i32
    return %c0_i32, %c0_i32_0 : i32, i32
  }
  func.func @transform_7(%arg0: i32, %arg1: i32) -> (i32, i32, i32) {
    %c0_i32 = arith.constant 0 : i32
    %c0_i32_0 = arith.constant 0 : i32
    return %arg0, %arg1, %c0_i32 : i32, i32, i32
  }
}

</mosaic_0001>

<bundles_post_ra>
// kernel: audio_pose_encoder_1d_pallas.1
= control target key start
LH: loop header
LB: loop body
LE: loop exit
PB: predicated region body
PF: predicated region fallthrough
CT: control target
= control target key end

     0   :  { %12 = vsyncpa [#allocation3], 0  ;;  %s2284_s0 = inlined_call_operand.vmem [shape: bf16[2,2,14,16], index: 0, kind: input, shape index: {}]   ;;  %s2285_s1 = inlined_call_operand.vmem [shape: bf16[3,16,128], index: 1, kind: input, shape index: {}]   ;;  %s2286_s2 = inlined_call_operand.vmem [shape: f32[1,128], index: 2, kind: input, shape index: {}]   ;;  %s2287_s3 = inlined_call_operand.vmem [shape: bf16[3,128,128], index: 3, kind: input, shape index: {}]   ;;  %s2288_s4 = inlined_call_operand.vmem [shape: f32[1,128], index: 4, kind: input, shape index: {}]   ;;  %s2289_s5 = inlined_call_operand.vmem [shape: bf16[3,128,128], index: 5, kind: input, shape index: {}]   ;;  %s2290_s6 = inlined_call_operand.vmem [shape: f32[1,128], index: 6, kind: input, shape index: {}]   ;;  %s2291_s7 = inlined_call_operand.hbm [shape: f32[2,16,32], index: 7, kind: output, shape index: {}]  }
   0x1   :  { %14 = vsyncpa [#allocation3 + $0x1], 0  ;;  %s1906_s24 = smov 0   ;;  %s1908_s25 = smov 0  }
   0x2   :  { %s1910_s26 = smov 0   ;;  %s1912_s27 = smov 0  }
   0x3   :  { %s1914_s28 = smov 0   ;;  %s1916_s29 = smov 0  }
   0x4   :  { %s1918_s30 = smov 0   ;;  %s1920_s8 = smov 0  }
   0x5 LB: > { %2295 = sst [smem:[#allocation5_spill]] %s1857_s30  ;;  %s1297_s9 = sadd.s32 4294967295, %s1861_s8   ;;  %s1861_s8 = sphi %s1920_s8, %s20_s8   ;;  %s1857_s30 = sphi %s1918_s30, %s2302_s30   ;;  %s1853_s29 = sphi %s1916_s29, %s2307_s29   ;;  %s1849_s28 = sphi %s1914_s28, %s2300_s28   ;;  %s1845_s27 = sphi %s1912_s27, %s2306_s27   ;;  %s1841_s26 = sphi %s1910_s26, %s2305_s26   ;;  %s1837_s25 = sphi %s1908_s25, %s2304_s25   ;;  %s1833_s24 = sphi %s1906_s24, %s2303_s24  }
   0x6   : > { %s1298_s10 = sadd.s32 4294967294, %s1861_s8   ;;  %s29_s11 = sadd.s32 1, %s1853_s29 }
   0x7   : > { %p30_p0 = scmp.ge.s32.totalorder %s29_s11, 2  ;;  %s32_s12 = sadd.s32 1, %s1857_s30 }
   0x8   : > { %p205_p1 = scmp.ne.s32.totalorder %s1841_s26, %s1837_s25  ;;  %p206_p2 = scmp.eq.s32.totalorder %s1297_s9, 3 }
   0x9   : > { %s2309_s11 = smov (%p30_p0, %s29_s11), 0  ;;  %s2311_s12 = smov (!%p30_p0, %s32_s12), %s1857_s30 }
   0xa   : > { %2296 = sst [smem:[#allocation6_spill]] %s2309_s11  ;;  %s191_s13 = ssub.s32 %s1853_s29, %s2309_s11 }
   0xb   : > { %p1957_p3 = por %p206_p2, %p205_p1  ;;  %p34_p4 = scmp.ge.s32.totalorder %s2311_s12, 2 }
   0xc   : > { %p211_p5 = scmp.ne.s32.totalorder %s1837_s25, %s1833_s24  ;;  %p212_p6 = scmp.eq.s32.totalorder %s1298_s10, 3 }
   0xd   : > { %p1301_p7 = scmp.ge.s32.totalorder %s1861_s8, 1  ;;  %s2313_s12 = smov (%p34_p4, %s2311_s12), 0 }
   0xe   : > { %2298 = sst [smem:[#allocation7_spill]] %s2313_s12  ;;  %p1966_p8 = por %p212_p6, %p211_p5 }
   0xf   : > { %p260_p9 = scmp.lt.s32.totalorder %s1861_s8, 5  ;;  %s190_s16 = ssub.s32 %s1857_s30, %s2313_s12 }
  0x10   : > { %s195_s17 = sadd.s32 1, %s1841_s26  ;;  %s192_s18 = sor.u32 %s191_s13, %s190_s16 }
  0x11   : > { %p261_p10 = pnand %p1301_p7, %p260_p9  ;;  %p193_p11 = scmp.eq.s32.totalorder %s192_s18, 0 }
  0x12   : > { %p296_p12 = scmp.lt.s32.totalorder (!%p261_p10), %s1849_s28, 1  ;;  %p298_p13 = scmp.lt.s32.totalorder (!%p261_p10), %s1845_s27, 1 }
  0x13   : > { %s1975_s19 = scalar_select %p193_p11, %s1841_s26, %s195_s17  }
  0x14   : > { %264 = sbr.rel (%p261_p10) target bundleno = 747 (0x2eb), region = 48  ;;  %s1442_s11 = sshll.u32 (!%p261_p10), %s1849_s28, 1 }
  0x15   : > { %s1865_s23 = smov (!%p261_p10), [#allocation2]  }
  0x19   : > { %v1717_v0 = vld [vmem:[%s2285_s1 + $0x8] sm:$0xff]   ;;  %v1863_v1 = vmov 0.0   ;;  %v1718_v2 = vld [vmem:[%s2285_s1] sm:$0xff]   ;;  %vm1864_vm0 = vmmov 0   ;;  %s297_s9 = scalar_select %p296_p12, %s1849_s28, 1  ;;  %vm331_vm1 = vcmask 130048   ;;  %v494_v29 = vlaneseq }
  0x1a   : > { %1506 = vmatprep.subr.bf16.mxu0 %v1863_v1  ;;  %1512 = vmatprep.subr.bf16.mxu1 %v1863_v1  ;;  %s299_s10 = scalar_select %p298_p13, %s1845_s27, 1  ;;  %v1723_v3 = vld [vmem:[%s2287_s3 + $0x78] sm:$0xff]   ;;  %v1720_v7 = vld [vmem:[%s2285_s1 + $0x10] sm:$0xff]   ;;  %v1724_v13 = vld [vmem:[%s2287_s3 + $0x28] sm:$0xff]  }
  0x1b   : > { %1507 = vmatpush3.bf16.msra.mxu0 %v1717_v0  ;;  %1508 = vmatprep.mubr.msk.bf16.mxu0 %vm1864_vm0, %v1863_v1  ;;  %s1304_s13 = sshll.u32 %s297_s9, 2  ;;  %v1721_v11 = vld [vmem:[%s2287_s3 + $0x38] sm:$0xff]   ;;  %v1722_v12 = vld [vmem:[%s2287_s3 + $0x30] sm:$0xff]   ;;  %v1726_v15 = vld [vmem:[%s2287_s3 + $0x20] sm:$0xff]   ;;  %v2076_v33 = vshrl.u32 %v494_v29, 7  ;;  %s1212_s9 = sadd.s32 %s1845_s27, %s1442_s11 }
  0x1c   : > { %1513 = vmatpush3.bf16.msra.mxu1 %v1718_v2  ;;  %1514 = vmatprep.mubr.msk.bf16.mxu1 %vm1864_vm0, %v1863_v1  ;;  %s1303_s16 = sshll.u32 %s299_s10, 1  ;;  %v1725_v14 = vld [vmem:[%s2287_s3 + $0x70] sm:$0xff]   ;;  %v1727_v16 = vld [vmem:[%s2287_s3 + $0x68] sm:$0xff]   ;;  %v1728_v17 = vld [vmem:[%s2287_s3 + $0x18] sm:$0xff]   ;;  %s1318_s10 = sshll.u32 %s1845_s27, 3 }
  0x1d   : > { %1518 = vmatprep.subr.bf16.mxu0 %v1863_v1  ;;  %1524 = vmatprep.subr.bf16.mxu1 %v1863_v1  ;;  %s302_s17 = sadd.s32 %s1304_s13, %s1303_s16  ;;  %v1729_v18 = vld [vmem:[%s2287_s3 + $0x60] sm:$0xff]   ;;  %v1730_v19 = vld [vmem:[%s2287_s3 + $0x10] sm:$0xff]   ;;  %v1731_v20 = vld [vmem:[%s2287_s3 + $0x58] sm:$0xff]   ;;  %s1319_s13 = sadd.s32 4294967294, %s1318_s10  ;;  %v2081_v35 = vadd.s32 8, %v2076_v33 }
  0x1e   : > { %s1305_s18 = sshll.u32 %s302_s17, 2  ;;  %v1732_v21 = vld [vmem:[%s2287_s3 + $0x8] sm:$0xff]   ;;  %v1733_v22 = vld [vmem:[%s2287_s3 + $0x50] sm:$0xff]   ;;  %v1734_v23 = vld [vmem:[%s2287_s3] sm:$0xff]   ;;  %v497_v37 = vstv %s1319_s13  ;;  %s1443_s17 = sshll.u32 %s1212_s9, 7 }
  0x1f   : > { %s304_s12 = scalar_lea.vmem %s2284_s0, %s1305_s18  ;;  %v1735_v24 = vld [vmem:[%s2287_s3 + $0x48] sm:$0xff]   ;;  %v1736_v25 = vld [vmem:[%s2287_s3 + $0x40] sm:$0xff]   ;;  %v499_v41 = vadd.s32 %v497_v37, %v2081_v35  ;;  %v498_v43 = vadd.s32 %v497_v37, %v2076_v33  ;;  %v1737_v60 = vld [vmem:[%s2287_s3 + $0xb8] sm:$0xff]   ;;  %s1380_s18 = sadd.s32 4294967295, %s1318_s10 }
  0x20   : > { %v1719_v4 = vld [vmem:[%s304_s12] sm:$0x7f]   ;;  %v1738_v62 = vld [vmem:[%s2287_s3 + $0xb0] sm:$0xff]   ;;  %v1739_v63 = vld [vmem:[%s2287_s3 + $0xa8] sm:$0xff]   ;;  %s293_s12 = sand.u32 1, %s1837_s25   ;;  %s2238_s28 = scalar_lea.hbm %s2291_s7, %s1443_s17 }
  0x21   : > { %v319_v5 = vshrl.u32 %v1719_v4, 16  ;;  %v321_v6 = vshll.u32 %v1719_v4, 16  ;;  %1515 = vmatmul.mubr.msk.bf16.vlgmr.msra.gmra.mxu1 %vm331_vm1, %v1719_v4  ;;  %v428_v9 = vrot.slane %v1719_v4, 1  ;;  %v1317_v40 = vld [vmem:[%s2286_s2] ss:$0 sm:$0xff]  ;;  %vm501_vm2 = vcmp.ge.s32.totalorder %v499_v41, 0 }
  0x22   : > { %1525 = vmatpush3.bf16.msra.mxu1 %v1723_v3  ;;  %1540 = vmatprep.mubr.msk.bf16.mxu1 %vm1864_vm0, %v1863_v1  ;;  %vm503_vm3 = vcmp.lt.s32.totalorder %v499_v41, 16  ;;  %vm500_vm4 = vcmp.ge.s32.totalorder %v498_v43, 0  ;;  %vm502_vm5 = vcmp.lt.s32.totalorder %v498_v43, 16  ;;  %v1740_v0 = vld [vmem:[%s2287_s3 + $0xa0] sm:$0xff]   ;;  %v1741_v2 = vld [vmem:[%s2287_s3 + $0x98] sm:$0xff]   ;;  %v1742_v3 = vld [vmem:[%s2287_s3 + $0x90] sm:$0xff]  }
  0x23   : > { %v323_v8 = vrot.slane %v321_v6, 1  ;;  %1526 = vmatprep.subr.bf16.mxu1 %v1863_v1  ;;  %vm505_vm6 = vmand %vm501_vm2, %vm503_vm3  ;;  %v1743_v4 = vld [vmem:[%s2287_s3 + $0x88] sm:$0xff]   ;;  %s1302_s30 = sshll.u32 %s293_s12, 3  ;;  %s1201_s27 = scalar_lea.sflag [#allocation3], %s293_s12 }
  0x24   : > { %vm504_vm7 = vmand %vm500_vm4, %vm502_vm5 }
  0x25   : > { %v324_v10 = vor.u32 %v323_v8, %v319_v5  ;;  %vm1352_vm8 = vmpackc.low %vm505_vm6, %vm504_vm7  ;;  %v1744_v5 = vld [vmem:[%s2287_s3 + $0x80] sm:$0xff]   ;;  %v1747_v8 = vld [vmem:[%s2289_s5 + $0x78] sm:$0xff]  }
  0x26   : > { %1527 = vmatpush3.bf16.msra.mxu1 %v1725_v14  ;;  %v1752_v14 = vld [vmem:[%s2289_s5 + $0x18] sm:$0xff]  }
  0x27   : > { %1509 = vmatmul.mubr.msk.bf16.vlgmr.msra.gmra.mxu0 %vm331_vm1, %v324_v10  ;;  %1528 = vmatprep.subr.bf16.mxu1 %v1863_v1  ;;  %v1749_v10 = vld [vmem:[%s2289_s5 + $0x70] sm:$0xff]  }
  0x28   : > { %1519 = vmatpush3.bf16.msra.mxu0 %v1720_v7  ;;  %1520 = vmatprep.mubr.msk.bf16.mxu0 %vm1864_vm0, %v1863_v1  ;;  %v1745_v7 = vld [vmem:[%s2289_s5 + $0x38] sm:$0xff]  }
  0x29   : > { %1544 = vmatprep.subr.bf16.mxu0 %v1863_v1 }
  0x2a   : > { %1529 = vmatpush3.bf16.msra.mxu1 %v1727_v16  ;;  %v1754_v16 = vld [vmem:[%s2289_s5 + $0x10] sm:$0xff]  }
  0x2b   : > { %1530 = vmatprep.subr.bf16.mxu1 %v1863_v1 }
  0x2e   : > { %1531 = vmatpush3.bf16.msra.mxu1 %v1729_v18  ;;  %v1756_v18 = vld [vmem:[%s2289_s5 + $0x8] sm:$0xff]  }
  0x2f   : > { %1521 = vmatmul.mubr.msk.bf16.vlgmr.msra.gmra.mxu0 %vm331_vm1, %v428_v9  ;;  %1532 = vmatprep.subr.bf16.mxu1 %v1863_v1  ;;  %v1746_v9 = vld [vmem:[%s2289_s5 + $0x30] sm:$0xff]  }
  0x30   : > { %1545 = vmatpush3.bf16.msra.mxu0 %v1721_v11  ;;  %1560 = vmatprep.mubr.msk.bf16.mxu0 %vm1864_vm0, %v1863_v1  ;;  %v1748_v11 = vld [vmem:[%s2289_s5 + $0x28] sm:$0xff]  }
  0x31   : > { %1546 = vmatprep.subr.bf16.mxu0 %v1863_v1 }
  0x32   : > { %1533 = vmatpush3.bf16.msra.mxu1 %v1731_v20  ;;  %v1758_v20 = vld [vmem:[%s2289_s5] sm:$0xff]  }
  0x33   : > { %1534 = vmatprep.subr.bf16.mxu1 %v1863_v1 }
  0x34   : > { %1547 = vmatpush3.bf16.msra.mxu0 %v1722_v12  ;;  %v1751_v12 = vld [vmem:[%s2289_s5 + $0x68] sm:$0xff]  }
  0x35   : > { %1548 = vmatprep.subr.bf16.mxu0 %v1863_v1 }
  0x36   : > { %1535 = vmatpush3.bf16.msra.mxu1 %v1733_v22  ;;  %v1760_v22 = vld [vmem:[%s2289_s5 + $0x40] sm:$0xff]  }
  0x37   : > { %1536 = vmatprep.subr.bf16.mxu1 %v1863_v1 }
  0x38   : > { %1549 = vmatpush3.bf16.msra.mxu0 %v1724_v13  ;;  %v1750_v13 = vld [vmem:[%s2289_s5 + $0x20] sm:$0xff]  }
  0x39   : > { %1550 = vmatprep.subr.bf16.mxu0 %v1863_v1 }
  0x3a   : > { %1537 = vmatpush3.bf16.msra.mxu1 %v1735_v24 }
  0x3b   : > { %1538 = vmatprep.subr.bf16.mxu1 %v1863_v1 }
  0x3c   : > { %1551 = vmatpush3.bf16.msra.mxu0 %v1726_v15  ;;  %v1753_v15 = vld [vmem:[%s2289_s5 + $0x60] sm:$0xff]  }
  0x3d   : > { %1552 = vmatprep.subr.bf16.mxu0 %v1863_v1 }
  0x3e   : > { %1539 = vmatpush3.bf16.msra.mxu1 %v1736_v25 }
  0x3f   : > { %1564 = vmatprep.subr.bf16.mxu1 %v1863_v1 }
  0x40   : > { %1553 = vmatpush3.bf16.msra.mxu0 %v1728_v17  ;;  %v1755_v17 = vld [vmem:[%s2289_s5 + $0x58] sm:$0xff]  }
  0x41   : > { %1554 = vmatprep.subr.bf16.mxu0 %v1863_v1 }
  0x44   : > { %1555 = vmatpush3.bf16.msra.mxu0 %v1730_v19  ;;  %v1757_v19 = vld [vmem:[%s2289_s5 + $0x50] sm:$0xff]  }
  0x45   : > { %1556 = vmatprep.subr.bf16.mxu0 %v1863_v1 }
  0x48   : > { %1557 = vmatpush3.bf16.msra.mxu0 %v1732_v21  ;;  %v1759_v21 = vld [vmem:[%s2289_s5 + $0x48] sm:$0xff]  }
  0x49   : > { %1558 = vmatprep.subr.bf16.mxu0 %v1863_v1 }
  0x4c   : > { %1559 = vmatpush3.bf16.msra.mxu0 %v1734_v23 }
  0x4d   : > { %1584 = vmatprep.subr.bf16.mxu0 %v1863_v1 }
  0xe1   : > { %v418_v26 = vpop.f32.mrf.mxu1 }
  0xe3   : > { %v1516_v27 = vpop.f32.mrf.mxu1 }
  0xe5   : > { %v421_v28 = vpop.f32.mrf.mxu1 }
  0xe7   : > { %v369_v30 = vpop.f32.mrf.mxu0  ;;  %v1517_v31 = vpop.f32.mrf.mxu1 }
  0xe8   : > { %v419_v38 = vadd.f32 %v418_v26, %v369_v30  ;;  %v851_v31 = vstv %s1380_s18  ;;  %s295_s18 = scalar_lea.vmem [#allocation2], %s1302_s30  ;;  %s1773_s30 = sshll.u32 %s1865_s23, 4  ;;  %s1774_s30 = int_to_ptr.vmem [resolvable:$false] %s1773_s30 }
  0xe9   : > { %v1510_v32 = vpop.f32.mrf.mxu0  ;;  %v853_v37 = vadd.s32 %v851_v31, %v2081_v35  ;;  %s1216_s20 = sshll.u32 %s295_s18, 4  ;;  %s1775_s11 = scalar_lea.vmem %s1774_s30, 256  ;;  %s1217_s20 = int_to_ptr.vmem [resolvable:$true] %s1216_s20 }
  0xea   : > { %s1769_s22 = scalar_lea.vmem %s1217_s20, 128  ;;  %p1776_p4 = scmp.lt.s32.totalorder %s1217_s20, %s1774_s30 }
  0xeb   : > { %v372_v34 = vpop.f32.mrf.mxu0  ;;  %vm855_vm9 = vcmp.ge.s32.totalorder %v853_v37, 0  ;;  %vm857_vm10 = vcmp.lt.s32.totalorder %v853_v37, 16  ;;  %p1770_p0 = scmp.ne.s32.totalorder %s1217_s20, %s1769_s22  ;;  %p1777_p5 = scmp.lt.s32.totalorder %s1775_s11, %s1769_s22 }
  0xec   : > { %v422_v45 = vadd.f32 %v421_v28, %v372_v34  ;;  %vm859_vm13 = vmand %vm855_vm9, %vm857_vm10 }
  0xed   : > { %v1511_v36 = vpop.f32.mrf.mxu0  ;;  %p1771_p1 = pnand %p1770_p0, %p1957_p3  ;;  %p1778_p6 = por %p1777_p5, %p1776_p4 }
  0xee   : > { %v1379_v36 = vld [vmem:[%s2288_s4] ss:$0 sm:$0xff] }
  0xef   : > { %v472_v39 = vpop.f32.mrf.mxu0  ;;  %p1772_p2 = pneg %p1771_p1 }
  0xf0   : > { %v479_v42 = vadd.f32 %v472_v39, %v419_v38  ;;  %v852_v39 = vadd.s32 %v851_v31, %v2076_v33 }
  0xf1   : > { %v1522_v44 = vpop.f32.mrf.mxu0  ;;  %p1779_p7 = pnand %p1778_p6, %p1772_p2 }
  0xf2   : > { %v488_v46 = vadd.f32 %v1317_v40, %v479_v42  ;;  %vm854_vm11 = vcmp.ge.s32.totalorder %v852_v39, 0  ;;  %vm856_vm12 = vcmp.lt.s32.totalorder %v852_v39, 16 }
  0xf3   : > { %v475_v47 = vpop.f32.mrf.mxu0  ;;  %vm858_vm14 = vmand %vm854_vm11, %vm856_vm12 }
  0xf4   : > { %v480_v48 = vadd.f32 %v475_v47, %v422_v45  ;;  %v490_v50 = vmax.f32 %v488_v46, 0.0  ;;  %vm1413_vm15 = vmpackc.low %vm859_vm13, %vm858_vm14 }
  0xf5   : > { %v1523_v49 = vpop.f32.mrf.mxu0 }
  0xf6   : > { %v489_v51 = vadd.f32 %v1317_v40, %v480_v48  ;;  %v506_v53 = vsel %vm504_vm7, %v490_v50, 0.0 }
  0xf8   : > { %v491_v52 = vmax.f32 %v489_v51, 0.0 }
  0xfa   : > { %v507_v54 = vsel %vm505_vm6, %v491_v52, 0.0  ;;  %v1353_v55 = vpack.c.bf16 %v491_v52, %v490_v50 }
  0xfb   : > { %v508_v56 = vpack.c.bf16 %v507_v54, %v506_v53  ;;  %v1761_v54 = vld [vmem:[%s2289_s5 + $0xb8] sm:$0xff]  }
  0xfc   : > { %1561 = vmatmul.mubr.msk.bf16.vlgmr.msra.gmra.mxu0 %vm1352_vm8, %v1353_v55 }
  0xfd   : > { %v545_v57 = vshll.u32 %v508_v56, 16  ;;  %1600 = vmatprep.mubr.msk.bf16.mxu0 %vm1864_vm0, %v1863_v1  ;;  %v543_v58 = vshrl.u32 %v508_v56, 16  ;;  %v746_v6 = vrot.slane %v508_v56, 1  ;;  %1585 = vmatpush3.bf16.msra.mxu0 %v1747_v8  ;;  %v1762_v56 = vld [vmem:[%s2289_s5 + $0xb0] sm:$0xff]  }
  0xfe   : > { %1586 = vmatprep.subr.bf16.mxu0 %v1863_v1 }
  0xff   : > { %v547_v59 = vrot.slane %v545_v57, 1  ;;  %v1763_v57 = vld [vmem:[%s2289_s5 + $0xa8] sm:$0xff]  }
 0x101   : > { %v548_v61 = vor.u32 %v547_v59, %v543_v58  ;;  %1587 = vmatpush3.bf16.msra.mxu0 %v1749_v10  ;;  %v1764_v58 = vld [vmem:[%s2289_s5 + $0xa0] sm:$0xff]   ;;  %v1765_v59 = vld [vmem:[%s2289_s5 + $0x98] sm:$0xff]  }
 0x102   : > { %1588 = vmatprep.subr.bf16.mxu0 %v1863_v1 }
 0x103   : > { %1541 = vmatmul.mubr.bf16.vlgmr.msra.gmra.mxu1 %v548_v61  ;;  %v1767_v61 = vld [vmem:[%s2289_s5 + $0x88] sm:$0xff]  }
 0x104   : > { %1565 = vmatpush3.bf16.msra.mxu1 %v1737_v60  ;;  %1580 = vmatprep.mubr.msk.bf16.mxu1 %vm1864_vm0, %v1863_v1  ;;  %v1766_v60 = vld [vmem:[%s2289_s5 + $0x90] sm:$0xff]  }
 0x105   : > { %1566 = vmatprep.subr.bf16.mxu1 %v1863_v1  ;;  %1589 = vmatpush3.bf16.msra.mxu0 %v1751_v12 }
 0x106   : > { %1590 = vmatprep.subr.bf16.mxu0 %v1863_v1 }
 0x108   : > { %1567 = vmatpush3.bf16.msra.mxu1 %v1738_v62  ;;  %v1768_v62 = vld [vmem:[%s2289_s5 + $0x80] sm:$0xff]  }
 0x109   : > { %1568 = vmatprep.subr.bf16.mxu1 %v1863_v1  ;;  %1591 = vmatpush3.bf16.msra.mxu0 %v1753_v15 }
 0x10a   : > { %1592 = vmatprep.subr.bf16.mxu0 %v1863_v1 }
 0x10c   : > { %1569 = vmatpush3.bf16.msra.mxu1 %v1739_v63 }
 0x10d   : > { %1570 = vmatprep.subr.bf16.mxu1 %v1863_v1  ;;  %1593 = vmatpush3.bf16.msra.mxu0 %v1755_v17 }
 0x10e   : > { %1594 = vmatprep.subr.bf16.mxu0 %v1863_v1 }
 0x110   : > { %1571 = vmatpush3.bf16.msra.mxu1 %v1740_v0 }
 0x111   : > { %1572 = vmatprep.subr.bf16.mxu1 %v1863_v1  ;;  %1595 = vmatpush3.bf16.msra.mxu0 %v1757_v19 }
 0x112   : > { %1596 = vmatprep.subr.bf16.mxu0 %v1863_v1 }
 0x114   : > { %1573 = vmatpush3.bf16.msra.mxu1 %v1741_v2 }
 0x115   : > { %1574 = vmatprep.subr.bf16.mxu1 %v1863_v1  ;;  %1597 = vmatpush3.bf16.msra.mxu0 %v1759_v21 }
 0x116   : > { %1598 = vmatprep.subr.bf16.mxu0 %v1863_v1 }
 0x118   : > { %1575 = vmatpush3.bf16.msra.mxu1 %v1742_v3 }
 0x119   : > { %1576 = vmatprep.subr.bf16.mxu1 %v1863_v1  ;;  %1599 = vmatpush3.bf16.msra.mxu0 %v1760_v22 }
 0x11a   : > { %1624 = vmatprep.subr.bf16.mxu0 %v1863_v1 }
 0x11c   : > { %1577 = vmatpush3.bf16.msra.mxu1 %v1743_v4 }
 0x11d   : > { %1578 = vmatprep.subr.bf16.mxu1 %v1863_v1 }
 0x120   : > { %1579 = vmatpush3.bf16.msra.mxu1 %v1744_v5 }
 0x121   : > { %1604 = vmatprep.subr.bf16.mxu1 %v1863_v1 }
 0x123   : > { %1581 = vmatmul.mubr.bf16.vlgmr.msra.gmra.mxu1 %v746_v6 }
 0x124   : > { %1620 = vmatprep.mubr.msk.bf16.mxu1 %vm1864_vm0, %v1863_v1  ;;  %1605 = vmatpush3.bf16.msra.mxu1 %v1745_v7 }
 0x125   : > { %1606 = vmatprep.subr.bf16.mxu1 %v1863_v1 }
 0x128   : > { %1607 = vmatpush3.bf16.msra.mxu1 %v1746_v9 }
 0x129   : > { %1608 = vmatprep.subr.bf16.mxu1 %v1863_v1 }
 0x12c   : > { %1609 = vmatpush3.bf16.msra.mxu1 %v1748_v11 }
 0x12d   : > { %1610 = vmatprep.subr.bf16.mxu1 %v1863_v1 }
 0x130   : > { %1611 = vmatpush3.bf16.msra.mxu1 %v1750_v13 }
 0x131   : > { %1612 = vmatprep.subr.bf16.mxu1 %v1863_v1 }
 0x134   : > { %1613 = vmatpush3.bf16.msra.mxu1 %v1752_v14 }
 0x135   : > { %1614 = vmatprep.subr.bf16.mxu1 %v1863_v1 }
 0x138   : > { %1615 = vmatpush3.bf16.msra.mxu1 %v1754_v16 }
 0x139   : > { %1616 = vmatprep.subr.bf16.mxu1 %v1863_v1 }
 0x13c   : > { %1617 = vmatpush3.bf16.msra.mxu1 %v1756_v18 }
 0x13d   : > { %1618 = vmatprep.subr.bf16.mxu1 %v1863_v1 }
 0x140   : > { %1619 = vmatpush3.bf16.msra.mxu1 %v1758_v20 }
 0x1bc   : > { %v721_v23 = vpop.f32.mrf.mxu0 }
 0x1be   : > { %v1562_v24 = vpop.f32.mrf.mxu0 }
 0x1c0   : > { %v724_v25 = vpop.f32.mrf.mxu0 }
 0x1c2   : > { %v1563_v26 = vpop.f32.mrf.mxu0 }
 0x1c3   : > { %v632_v27 = vpop.f32.mrf.mxu1 }
 0x1c4   : > { %v722_v32 = vadd.f32 %v721_v23, %v632_v27 }
 0x1c5   : > { %v1542_v28 = vpop.f32.mrf.mxu1 }
 0x1c7   : > { %v635_v29 = vpop.f32.mrf.mxu1 }
 0x1c8   : > { %v725_v41 = vadd.f32 %v724_v25, %v635_v29 }
 0x1c9   : > { %v1543_v30 = vpop.f32.mrf.mxu1 }
 0x1e3   : > { %v830_v34 = vpop.f32.mrf.mxu1 }
 0x1e4   : > { %v837_v38 = vadd.f32 %v830_v34, %v722_v32 }
 0x1e5   : > { %v1582_v40 = vpop.f32.mrf.mxu1 }
 0x1e6   : > { %v846_v42 = vadd.f32 %v1379_v36, %v837_v38 }
 0x1e7   : > { %v833_v43 = vpop.f32.mrf.mxu1 }
 0x1e8   : > { %v838_v44 = vadd.f32 %v833_v43, %v725_v41  ;;  %v848_v46 = vmax.f32 %v846_v42, 0.0 }
 0x1e9   : > { %v1583_v45 = vpop.f32.mrf.mxu1 }
 0x1ea   : > { %v847_v47 = vadd.f32 %v1379_v36, %v838_v44  ;;  %v860_v35 = vsel %vm858_vm14, %v848_v46, 0.0 }
 0x1ec   : > { %v849_v48 = vmax.f32 %v847_v47, 0.0 }
 0x1ee   : > { %v861_v49 = vsel %vm859_vm13, %v849_v48, 0.0  ;;  %v1414_v50 = vpack.c.bf16 %v849_v48, %v848_v46 }
 0x1ef   : > { %v862_v33 = vpack.c.bf16 %v861_v49, %v860_v35 }
 0x1f0   : > { %1621 = vmatmul.mubr.msk.bf16.vlgmr.msra.gmra.mxu1 %vm1413_vm15, %v1414_v50 }
 0x1f1   : > { %v899_v51 = vshll.u32 %v862_v33, 16  ;;  %v897_v52 = vshrl.u32 %v862_v33, 16  ;;  %v1098_v63 = vrot.slane %v862_v33, 1 }
 0x1f3   : > { %v901_v53 = vrot.slane %v899_v51, 1 }
 0x1f5   : > { %v902_v55 = vor.u32 %v901_v53, %v897_v52 }
 0x1f7   : > { %1601 = vmatmul.mubr.bf16.vlgmr.msra.gmra.mxu0 %v902_v55 }
 0x1f8   : > { %1625 = vmatpush3.bf16.msra.mxu0 %v1761_v54  ;;  %1640 = vmatprep.mubr.msk.bf16.mxu0 %vm1864_vm0, %v1863_v1  ;;  %vm1198_vm0 = vcmask 261120  }
 0x1f9   : > { %1626 = vmatprep.subr.bf16.mxu0 %v1863_v1 }
 0x1fc   : > { %1627 = vmatpush3.bf16.msra.mxu0 %v1762_v56 }
 0x1fd   : > { %1628 = vmatprep.subr.bf16.mxu0 %v1863_v1 }
 0x200   : > { %1629 = vmatpush3.bf16.msra.mxu0 %v1763_v57 }
 0x201   : > { %1630 = vmatprep.subr.bf16.mxu0 %v1863_v1 }
 0x204   : > { %1631 = vmatpush3.bf16.msra.mxu0 %v1764_v58 }
 0x205   : > { %1632 = vmatprep.subr.bf16.mxu0 %v1863_v1 }
 0x208   : > { %1633 = vmatpush3.bf16.msra.mxu0 %v1765_v59 }
 0x209   : > { %1634 = vmatprep.subr.bf16.mxu0 %v1863_v1 }
 0x20c   : > { %1635 = vmatpush3.bf16.msra.mxu0 %v1766_v60 }
 0x20d   : > { %1636 = vmatprep.subr.bf16.mxu0 %v1863_v1 }
 0x210   : > { %1637 = vmatpush3.bf16.msra.mxu0 %v1767_v61 }
 0x211   : > { %1638 = vmatprep.subr.bf16.mxu0 %v1863_v1  ;;  %v1440_v1 = vld [vmem:[%s2290_s6] ss:$0 sm:$0xff] }
 0x214   : > { %1639 = vmatpush3.bf16.msra.mxu0 %v1768_v62 }
 0x217   : > { %1641 = vmatmul.mubr.bf16.vlgmr.msra.gmra.mxu0 %v1098_v63 }
 0x2b0   : > { %v1074_v0 = vpop.f32.mrf.mxu1 }
 0x2b2   : > { %v1622_v2 = vpop.f32.mrf.mxu1 }
 0x2b4   : > { %v1077_v3 = vpop.f32.mrf.mxu1 }
 0x2b6   : > { %v1623_v4 = vpop.f32.mrf.mxu1 }
 0x2b7   : > { %v986_v5 = vpop.f32.mrf.mxu0 }
 0x2b8   : > { %v1075_v9 = vadd.f32 %v1074_v0, %v986_v5 }
 0x2b9   : > { %v1602_v6 = vpop.f32.mrf.mxu0 }
 0x2bb   : > { %v989_v7 = vpop.f32.mrf.mxu0 }
 0x2bd   : > { %v1603_v8 = vpop.f32.mrf.mxu0 }
 0x2d7   : > { %v1182_v10 = vpop.f32.mrf.mxu0 }
 0x2d8   : > { %v1188_v11 = vadd.f32 %v1182_v10, %v1075_v9 }
 0x2d9   : > { %v1642_v12 = vpop.f32.mrf.mxu0 }
 0x2da   : > { %v1196_v13 = vadd.f32 %v1440_v1, %v1188_v11 }
 0x2db   : > { %v1185_v14 = vpop.f32.mrf.mxu0 }
 0x2dc   : > { %v1197_v15 = vmax.f32 %v1196_v13, 0.0 }
 0x2dd   : > { %v1643_v16 = vpop.f32.mrf.mxu0 }
 0x2de   : > { %1199 = vst.msk [vmem:[%s295_s18] sm:$0xff] %vm1198_vm0, %v1197_v15 }
 0x2df   : > { %1782 = shalt.err (!%p1779_p7)
}
 0x2e0   : > { %s1783_s9 = scalar_lea.hbm %s2238_s28, 128  ;;  %s1787_s16 = scalar_lea.hbm %s2291_s7, 512 }
 0x2e1   : > { %p1784_p9 = scmp.ne.s32.totalorder %s2238_s28, %s1783_s9  ;;  %p1788_p12 = scmp.lt.s32.totalorder %s2238_s28, %s2291_s7 }
 0x2e2   : > { %p1789_p13 = scmp.lt.s32.totalorder %s1787_s16, %s1783_s9 }
 0x2e3   : > { %p1785_p10 = pnand %p1784_p9, %p1957_p3 }
 0x2e4   : > { %p1790_p0 = por %p1789_p13, %p1788_p12 }
 0x2e5   : > { %p1786_p11 = pneg %p1785_p10 }
 0x2e7   : > { %p1791_p1 = pnand %p1790_p0, %p1786_p11 }
 0x2e9   : > { %1794 = shalt.err (!%p1791_p1)
}
 0x2ea   : > { %1644 = dma.vmem_to_hbm [thread:$0]  (%p1957_p3), %s1217_s20, 128, %s2238_s28, %s1201_s27  }
 0x2eb PF: > { %p1650_p2 = scmp.ge.s32.totalorder %s1861_s8, 2  ;;  %s1228_s21 = sand.u32 1, %s1833_s24  }
 0x2ec   : > { %s1229_s10 = scalar_lea.sflag [#allocation3], %s1228_s21 }
 0x2ed   : > { %p1647_p4 = pnand %p1650_p2, %p1966_p8 }
 0x2ef   : > { %p1648_p5 = pneg %p1647_p4 }
 0x2f1   : > { %1828 = dma.done.wait (%p1648_p5), %s1229_s10, 128  }
 0x2f2   : > { %1830 = vsyncadd (%p1648_p5), %s1229_s10, 4294967168  ;;  %s20_s8 = sadd.s32 1, %s1861_s8   ;;  %s2300_s28 = sld [smem:[#allocation5_spill]] }
 0x2f3   : > { %p17_p6 = scmp.ge.s32.totalorder %s20_s8, 6   ;;  %s2301_s14 = sld [smem:[#allocation6_spill]] }
 0x2f4   : > { %s2302_s30 = sld [smem:[#allocation7_spill]]  ;;  %s2303_s24 = smov %s1837_s25 }
 0x2f5   : > { %s2304_s25 = smov %s1841_s26  ;;  %s2305_s26 = smov %s1975_s19 }
 0x2f6   : > { %s2306_s27 = smov %s1853_s29  ;;  %19 = sbr.rel (!%p17_p6) target bundleno = 5 (0x5), region = 89 }
 0x2f9   : > { %s2307_s29 = smov %s2301_s14 }
 0x2fb   :  { %1234 = vsyncpa [#allocation3], 1 }
 0x2fc   :  { %1236 = vsyncpa [#allocation3 + $0x1], 1 }

</bundles_post_ra>
